<compile_context>
chip_gen: v7x
topology: tpu7x:2x2x1
jax: 0.10.0
libtpu: 0.0.40
codegen_flags: <defaults>
</compile_context>

<pallas_src>
import math

import jax
import jax.numpy as jnp
from jax.experimental import pallas as pl
from jax.experimental.pallas import tpu as pltpu

_LANES = 128
_MAX_SLAB_LANES = 2048           # cap on lane-dense slab width lcm(D, 128)
_MAX_D_TILE = 2048               # generic-path lane tile (multiple of 128)
_VMEM_PIPE_BUDGET = 20 << 20     # bytes for the double-buffered in/out tiles
_VMEM_LIMIT = 40 << 20           # scoped VMEM limit: > v5e default, < v7x physical


def _cdiv(a, b):
    return -(-a // b)


def _round_up(x, m):
    return ((x + m - 1) // m) * m


def _sublane_multiple(dtype):
    # Native second-to-last tile dim: f32 -> 8, bf16 -> 16, int8/fp8 -> 32.
    return max(8, 32 // jnp.dtype(dtype).itemsize)


def _choose_tile(rows, sub, max_rows, *, min_rows=512, target_steps=8):
    """Row-tile chooser: big tiles to amortize the ~0.35us per-step overhead,
    but capped so the grid keeps >= target_steps steps (v7x megacore + DMA
    overlap), never below `min_rows` for small problems, always a multiple of
    the dtype's sublane packing, and never larger than the (padded) array."""
    max_rows = max(sub, (max_rows // sub) * sub)
    min_rows = max(sub, _round_up(min_rows, sub))
    t = _round_up(_cdiv(rows, target_steps), sub)
    t = max(t, min_rows)
    t = min(t, max_rows, rows)
    return max(sub, (t // sub) * sub)


def _adapter_packed_kernel(x_ref, w_ref, b_ref, o_ref):
    """Lane-dense slab path.

    x_ref: (TM, g)   g consecutive scalar inputs per slab row
    w_ref: (g, L)    expansion matrix, w_ref[k, k*D + j] = weight[j]
    b_ref: (1, L)    bias tiled g times along lanes
    o_ref: (TM, L)   out[r, k*D + j] = x[r, k] * weight[j] + bias[j]

    The scalar->lane broadcast rides the MXU (vector-extended slot) and hides
    under the HBM stores; the VPU only does the bias add and the final cast.
    """
    x = x_ref[...].astype(jnp.float32)
    o = jnp.dot(x, w_ref[...], preferred_element_type=jnp.float32,
                precision=jax.lax.Precision.HIGHEST)
    o_ref[...] = (o + b_ref[...]).astype(o_ref.dtype)


def _adapter_generic_kernel(x_ref, w_ref, b_ref, o_ref):
    """Generic path: x (TR, 1), w/b (1, TD), out (TR, TD). Pure VPU FMA."""
    x = x_ref[...].astype(jnp.float32)
    o_ref[...] = (x * w_ref[...] + b_ref[...]).astype(o_ref.dtype)


def adapter_layer_1to1(x, weight, bias, *, max_tile_rows=8192,
                       min_pallas_elements=1 << 20):
    """x: (..., 1); weight: (D, 1); bias: (D,). Returns (..., D) in x.dtype."""
    d = weight.shape[0]
    orig_shape = x.shape
    assert orig_shape[-1] == 1, "AdapterLayer1to1 expects last input dim == 1"
    out_dtype = x.dtype

    n = 1
    for s in orig_shape[:-1]:
        n *= s

    w_row = weight.reshape(1, d).astype(jnp.float32)
    b_row = bias.reshape(1, d).astype(jnp.float32)
    x_flat = x.reshape(n, 1)  # keep model dtype end-to-end

    # Tiny problems: a fused XLA broadcast beats any kernel launch.
    if n == 0 or n * d < min_pallas_elements:
        out2d = (x_flat.astype(jnp.float32) * w_row + b_row).astype(out_dtype)
        return out2d.reshape(orig_shape[:-1] + (d,))

    sub = _sublane_multiple(out_dtype)
    x_item = jnp.dtype(x.dtype).itemsize
    out_item = jnp.dtype(out_dtype).itemsize

    lanes = (d * _LANES) // math.gcd(d, _LANES)   # lcm(D, 128)
    g = lanes // d                                # scalars packed per slab row

    if g >= 2 and lanes <= _MAX_SLAB_LANES:
        # ---------------- lane-dense slab path (MXU broadcast) ----------------
        row_align = g * sub                       # tiny pad: < g*sub extra rows
        n_row_pad = _round_up(n, row_align)
        if n_row_pad != n:
            x_flat = jnp.pad(x_flat, ((0, n_row_pad - n), (0, 0)))
        n_slab = n_row_pad // g
        x_slab = x_flat.reshape(n_slab, g)

        # w_expand[k, k*d + j] = w[j]; bias tiled g times along lanes.
        w_expand = (jnp.eye(g, dtype=jnp.float32)[:, :, None]
                    * w_row.reshape(1, 1, d)).reshape(g, lanes)
        b_pack = jnp.tile(b_row, (1, g))          # (1, lanes)

        # VMEM per slab row: (tile, g) input is lane-padded to 128 lanes,
        # output is `lanes` wide; both double-buffered.
        per_row = 2 * (_LANES * x_item + lanes * out_item)
        vmem_cap_rows = max(sub, (_VMEM_PIPE_BUDGET // per_row) // sub * sub)
        tile = _choose_tile(n_slab, sub, min(max_tile_rows, vmem_cap_rows))

        out_slab = pl.pallas_call(
            _adapter_packed_kernel,
            out_shape=jax.ShapeDtypeStruct((n_slab, lanes), out_dtype),
            grid_spec=pltpu.PrefetchScalarGridSpec(
                num_scalar_prefetch=0,
                grid=(pl.cdiv(n_slab, tile),),    # ragged last block is masked
                in_specs=[
                    pl.BlockSpec((tile, g), lambda i: (i, 0)),
                    pl.BlockSpec((g, lanes), lambda i: (0, 0)),
                    pl.BlockSpec((1, lanes), lambda i: (0, 0)),
                ],
                out_specs=pl.BlockSpec((tile, lanes), lambda i: (i, 0)),
            ),
            compiler_params=pltpu.CompilerParams(
                dimension_semantics=("parallel",),
                vmem_limit_bytes=_VMEM_LIMIT,
            ),
        )(x_slab, w_expand, b_pack)

        # Row-major unpack of the slab is a free reshape (no data movement).
        out2d = out_slab.reshape(n_row_pad, d)
        if n_row_pad != n:
            # Only hit when N is not a multiple of g*sub; the pad itself is
            # < g*sub rows.  (If profiling shows the slice materializing,
            # check that it fuses into the downstream consumer in HLO.)
            out2d = out2d[:n]
    else:
        # ---------------- generic path (lane-tiled D, VPU FMA) ----------------
        n_pad = _round_up(n, sub)                 # pad < sub rows only
        if n_pad != n:
            x_flat = jnp.pad(x_flat, ((0, n_pad - n), (0, 0)))

        tile_d = d if d <= _MAX_D_TILE else _MAX_D_TILE  # ==d or multiple of 128
        per_row = 2 * (_LANES * x_item + tile_d * out_item)
        vmem_cap_rows = max(sub, (_VMEM_PIPE_BUDGET // per_row) // sub * sub)
        tile_r = _choose_tile(n_pad, sub, min(max_tile_rows, vmem_cap_rows))

        out2d = pl.pallas_call(
            _adapter_generic_kernel,
            out_shape=jax.ShapeDtypeStruct((n_pad, d), out_dtype),
            grid_spec=pltpu.PrefetchScalarGridSpec(
                num_scalar_prefetch=0,
                grid=(pl.cdiv(n_pad, tile_r), pl.cdiv(d, tile_d)),
                in_specs=[
                    pl.BlockSpec((tile_r, 1), lambda i, j: (i, 0)),
                    pl.BlockSpec((1, tile_d), lambda i, j: (0, j)),
                    pl.BlockSpec((1, tile_d), lambda i, j: (0, j)),
                ],
                out_specs=pl.BlockSpec((tile_r, tile_d), lambda i, j: (i, j)),
            ),
            compiler_params=pltpu.CompilerParams(
                dimension_semantics=("parallel", "parallel"),
                vmem_limit_bytes=_VMEM_LIMIT,
            ),
        )(x_flat, w_row, b_row)
        if n_pad != n:
            out2d = out2d[:n]

    return out2d.reshape(orig_shape[:-1] + (d,))


if __name__ == "__main__":
    key = jax.random.PRNGKey(0)
    k_x, k_w, k_x2, k_x4, k_w4, k_x5, k_w5 = jax.random.split(key, 7)

    def ref_fn(x, w, b):
        return (jnp.einsum("...k,dk->...d", x.astype(jnp.float32),
                           w.astype(jnp.float32))
                + b.astype(jnp.float32))

    # --- 1) Spec-like shape: D=32, batch=2, seq=8 (packed path, g=4) ---
    d1 = 32
    w1 = jax.random.normal(k_w, (d1, 1), dtype=jnp.float32)
    b1 = jnp.zeros((d1,), dtype=jnp.float32)
    x1 = jax.random.normal(k_x, (2, 8, 1), dtype=jnp.float32)
    o1 = jax.block_until_ready(adapter_layer_1to1(x1, w1, b1,
                                                  min_pallas_elements=0))
    assert o1.shape == (2, 8, d1)
    # Tolerance covers a possible reduced-precision MXU pass for f32 operands.
    assert jnp.allclose(o1, ref_fn(x1, w1, b1), atol=1e-2, rtol=1e-2)

    # --- 2) Multi-tile packed path with row padding + ragged last row block ---
    x2 = jax.random.normal(k_x2, (3, 70, 1), dtype=jnp.float32)
    o2 = jax.block_until_ready(adapter_layer_1to1(x2, w1, b1, max_tile_rows=16,
                                                  min_pallas_elements=0))
    assert jnp.allclose(o2, ref_fn(x2, w1, b1), atol=1e-2, rtol=1e-2)

    # --- 3) bf16 model dtype passes through (output bf16, math in f32) ---
    x3 = x1.astype(jnp.bfloat16)
    o3 = jax.block_until_ready(adapter_layer_1to1(x3, w1, b1,
                                                  min_pallas_elements=0))
    assert o3.dtype == jnp.bfloat16
    assert jnp.allclose(o3.astype(jnp.float32), ref_fn(x3, w1, b1),
                        atol=2e-2, rtol=2e-2)

    # --- 4) D=48 now takes the packed path (slab width lcm(48,128)=384, g=8) ---
    d4 = 48
    w4 = jax.random.normal(k_w4, (d4, 1), dtype=jnp.float32)
    b4 = jnp.zeros((d4,), dtype=jnp.float32)
    x4 = jax.random.normal(k_x4, (5, 30, 1), dtype=jnp.float32)
    o4 = jax.block_until_ready(adapter_layer_1to1(x4, w4, b4,
                                                  min_pallas_elements=0))
    assert jnp.allclose(o4, ref_fn(x4, w4, b4), atol=1e-2, rtol=1e-2)

    # --- 5) Generic path (D=200: lcm(200,128)=3200 > slab cap), ragged rows ---
    d5 = 200
    w5 = jax.random.normal(k_w5, (d5, 1), dtype=jnp.float32)
    b5 = jnp.zeros((d5,), dtype=jnp.float32)
    x5 = jax.random.normal(k_x5, (4, 13, 1), dtype=jnp.float32)
    o5 = jax.block_until_ready(adapter_layer_1to1(x5, w5, b5, max_tile_rows=16,
                                                  min_pallas_elements=0))
    assert jnp.allclose(o5, ref_fn(x5, w5, b5), atol=1e-5, rtol=1e-5)

    print("KERNEL_OK")
</pallas_src>

<mosaic_0001>
module attributes {stable_mosaic.version = 11 : i64} {
  func.func @_adapter_packed_kernel(%arg0: i32, %arg1: memref<8x4xf32, #tpu.memory_space<vmem>>, %arg2: memref<4x128xf32, #tpu.memory_space<vmem>>, %arg3: memref<1x128xf32, #tpu.memory_space<vmem>>, %arg4: memref<8x128xf32, #tpu.memory_space<vmem>>) attributes {dimension_semantics = [#tpu.dimension_semantics<parallel>], iteration_bounds = array<i64: 1>, scalar_prefetch = 0 : i64, scratch_operands = 0 : i64, tpu.core_type = #tpu.core_type<tc>, window_params = [{transform_indices = @transform_0, window_bounds = array<i64: 8, 4>}, {pipeline_mode = #tpu.pipeline_mode<synchronous>, transform_indices = @transform_1, window_bounds = array<i64: 4, 128>}, {pipeline_mode = #tpu.pipeline_mode<synchronous>, transform_indices = @transform_2, window_bounds = array<i64: 1, 128>}, {transform_indices = @transform_3, window_bounds = array<i64: 8, 128>}]} {
    %c0 = arith.constant 0 : index
    %c0_0 = arith.constant 0 : index
    %0 = vector.load %arg1[%c0, %c0_0] : memref<8x4xf32, #tpu.memory_space<vmem>>, vector<8x4xf32>
    %c0_1 = arith.constant 0 : index
    %c0_2 = arith.constant 0 : index
    %1 = vector.load %arg2[%c0_1, %c0_2] : memref<4x128xf32, #tpu.memory_space<vmem>>, vector<4x128xf32>
    %cst = arith.constant dense<0.000000e+00> : vector<8x128xf32>
    %2 = tpu.matmul %0, %1, %cst {dimension_numbers = #tpu.dot_dimension_numbers<[1], [0], [0], [1], [0, 0, 1, 1], [], []>, precision = #tpu.contract_precision<fp32>} : vector<8x4xf32>, vector<4x128xf32>, vector<8x128xf32> -> vector<8x128xf32>
    %c0_3 = arith.constant 0 : index
    %c0_4 = arith.constant 0 : index
    %3 = vector.load %arg3[%c0_3, %c0_4] : memref<1x128xf32, #tpu.memory_space<vmem>>, vector<1x128xf32>
    %4 = vector.broadcast %3 : vector<1x128xf32> to vector<8x128xf32>
    %5 = arith.addf %2, %4 : vector<8x128xf32>
    %c0_5 = arith.constant 0 : index
    %c0_6 = arith.constant 0 : index
    %6 = vector.load %arg4[%c0_5, %c0_6] : memref<8x128xf32, #tpu.memory_space<vmem>>, vector<8x128xf32>
    tpu.vector_store %arg4[%c0_5, %c0_6], %5 {strides = array<i32>} : memref<8x128xf32, #tpu.memory_space<vmem>>, vector<8x128xf32>,
    return
  }
  func.func @transform_0(%arg0: i32) -> (i32, i32) {
    %c0_i32 = arith.constant 0 : i32
    %c0_i32_0 = arith.constant 0 : i32
    return %arg0, %c0_i32 : i32, i32
  }
  func.func @transform_1(%arg0: i32) -> (i32, i32) {
    %c0_i32 = arith.constant 0 : i32
    %c0_i32_0 = arith.constant 0 : i32
    %c0_i32_1 = arith.constant 0 : i32
    return %c0_i32, %c0_i32_0 : i32, i32
  }
  func.func @transform_2(%arg0: i32) -> (i32, i32) {
    %c0_i32 = arith.constant 0 : i32
    %c0_i32_0 = arith.constant 0 : i32
    %c0_i32_1 = arith.constant 0 : i32
    return %c0_i32, %c0_i32_0 : i32, i32
  }
  func.func @transform_3(%arg0: i32) -> (i32, i32) {
    %c0_i32 = arith.constant 0 : i32
    %c0_i32_0 = arith.constant 0 : i32
    return %arg0, %c0_i32 : i32, i32
  }
}

</mosaic_0001>

<bundles_post_ra>
// kernel: tpu_custom_call.1
= control target key start
LH: loop header
LB: loop body
LE: loop exit
PB: predicated region body
PF: predicated region fallthrough
CT: control target
= control target key end

     0   :  { %vm28_vm0 = vcmask 1043456   ;;  %v573_v2 = vmov 0.0   ;;  %vm574_vm1 = vmmov 0   ;;  %vm24_vm2 = vcmask 31744   ;;  %s623_s0 = inlined_call_operand.vmem [shape: f32[8,4], index: 0, kind: input, shape index: {}]   ;;  %s624_s1 = inlined_call_operand.vmem [shape: f32[4,128], index: 1, kind: input, shape index: {}]   ;;  %s625_s2 = inlined_call_operand.vmem [shape: f32[1,128], index: 2, kind: input, shape index: {}]   ;;  %s626_s3 = inlined_call_operand.hbm [shape: f32[8,128], index: 3, kind: output, shape index: {}]  }
   0x1   :  { %v16_v0 = vld [vmem:[%s624_s1] sm:$0xf]  ;;  %521 = vmatprep.subr.mxu0 %v573_v2  ;;  %523 = vmatprep.mubr.msk.f32.mxu0 %vm574_vm1, %v573_v2 }
   0x2   :  { %v15_v1 = vld [vmem:[%s623_s0] sm:$0xff]  ;;  %v30_v3 = vsel %vm28_vm0, %v16_v0, 0 }
   0x3   :  { %8 = vsyncpa [#allocation3], 0  ;;  %v33_v4 = vand.u32 4294901760, %v30_v3  ;;  %v26_v5 = vsel %vm24_vm2, %v15_v1, 0  ;;  %506 = vmatprep.subr.mxu1 %v573_v2  ;;  %508 = vmatprep.mubr.msk.f32.mxu1 %vm574_vm1, %v573_v2  ;;  %v493_v17 = vld [vmem:[%s625_s2] ss:$0 sm:$0xff] }
   0x4   :  { %v98_v6 = vand.u32 4294901760, %v26_v5  ;;  %s575_s16 = smov [#allocation2]  }
   0x5   :  { %v110_v7 = vsub.f32 %v30_v3, %v33_v4  ;;  %522 = vmatpush3.msra.mxu0 %v33_v4  ;;  %507 = vmatpush3.msra.mxu1 %v33_v4  ;;  %s485_s17 = sshll.u32 %s575_s16, 4  ;;  %s486_s17 = int_to_ptr.vmem [resolvable:$true] %s485_s17 }
   0x6   :  { %v99_v8 = vsub.f32 %v26_v5, %v98_v6  ;;  %511 = vmatprep.subr.mxu1 %v573_v2  ;;  %526 = vmatprep.subr.mxu0 %v573_v2  ;;  %s549_s18 = scalar_lea.vmem %s486_s17, 128  ;;  %p554_p1 = scmp.lt.s32.totalorder %s486_s17, %s486_s17 }
   0x7   :  { %v111_v9 = vand.u32 4294901760, %v110_v7  ;;  %p550_p0 = scmp.ne.s32.totalorder %s486_s17, %s549_s18  ;;  %p555_p2 = scmp.lt.s32.totalorder %s549_s18, %s549_s18 }
   0x8   :  { %v100_v10 = vand.u32 4294901760, %v99_v8 }
   0x9   :  { %v112_v11 = vsub.f32 %v110_v7, %v111_v9  ;;  %p556_p3 = por %p555_p2, %p554_p1 }
   0xa   :  { %524 = vmatmul.mubr.f32.vlgmr.msra.gmra.mrb[0].mxu0 %v100_v10  ;;  %v101_v12 = vsub.f32 %v99_v8, %v100_v10 }
   0xb   :  { %v113_v13 = vand.u32 4294901760, %v112_v11  ;;  %527 = vmatpush3.msra.mxu0 %v111_v9  ;;  %528 = vmatprep.mubr.msk.f32.mxu0 %vm574_vm1, %v573_v2  ;;  %p557_p4 = pnand %p556_p3, %p550_p0 }
   0xc   :  { %v102_v14 = vand.u32 4294901760, %v101_v12  ;;  %531 = vmatprep.subr.mxu0 %v573_v2 }
   0xe   :  { %509 = vmatmul.mubr.f32.vlgmr.msra.gmra.mrb[0].mxu1 %v102_v14 }
   0xf   :  { %512 = vmatpush3.msra.mxu1 %v113_v13  ;;  %513 = vmatprep.mubr.msk.f32.mxu1 %vm574_vm1, %v573_v2 }
  0x10   :  { %516 = vmatprep.subr.mxu1 %v573_v2 }
  0x12   :  { %529 = vmatmul.mubr.f32.vlgmr.msra.gmra.mrb[0].mxu0 %v98_v6 }
  0x13   :  { %532 = vmatpush3.msra.mxu0 %v33_v4  ;;  %533 = vmatprep.mubr.msk.f32.mxu0 %vm574_vm1, %v573_v2 }
  0x16   :  { %514 = vmatmul.mubr.f32.vlgmr.msra.gmra.mrb[0].mxu1 %v98_v6 }
  0x17   :  { %517 = vmatpush3.msra.mxu1 %v110_v7  ;;  %518 = vmatprep.mubr.msk.f32.mxu1 %vm574_vm1, %v573_v2 }
  0x1a   :  { %534 = vmatmul.mubr.f32.vlgmr.msra.gmra.mrb[0].mxu0 %v98_v6 }
  0x1e   :  { %519 = vmatmul.mubr.f32.vlgmr.msra.gmra.mrb[0].mxu1 %v99_v8 }
  0xed   :  { %v474_v15 = vpop.f32.mrb[0].mxu0 }
  0xee   :  { %v535_v16 = vpop.f32.mrb[1].mxu0 }
  0xf1   :  { %v254_v18 = vpop.f32.mrb[0].mxu1 }
  0xf2   :  { %v536_v19 = vadd.f32 %v493_v17, %v254_v18  ;;  %v520_v20 = vpop.f32.mrb[1].mxu1 }
  0xf4   :  { %v537_v21 = vadd.f32 %v536_v19, %v474_v15 }
  0xf6   :  { %478 = vst [vmem:[#allocation2] sm:$0xff] %v537_v21 }
  0xf7   :  { %560 = shalt.err (!%p557_p4)
}
  0xf8   :  { %s561_s21 = scalar_lea.hbm %s626_s3, 128 }
  0xf9   :  { %p562_p5 = scmp.ne.s32.totalorder %s626_s3, %s561_s21  ;;  %p565_p6 = scmp.lt.u32.totalorder %s561_s21, %s626_s3 }
  0xfb   :  { %p567_p7 = pnand %p565_p6, %p562_p5 }
  0xfd   :  { %570 = shalt.err (!%p567_p7)
}
  0xfe   :  { %488 = dma.vmem_to_hbm [thread:$0]  %s486_s17, 128, %s626_s3, [#allocation3]  }
  0xff   :  { %571 = dma.done.wait [#allocation3], 128  }
 0x100   :  { %572 = vsyncadd [#allocation3], 4294967168 }
 0x101   :  { %492 = vsyncpa [#allocation3], 1 }

</bundles_post_ra>
